<compile_context>
chip_gen: v5e
topology: v5e:2x2
jax: 0.10.0
libtpu: 0.0.40
codegen_flags: <defaults>
</compile_context>

<pallas_src>
import math
from functools import partial

import jax
import jax.numpy as jnp
from jax.experimental import pallas as pl
from jax.experimental.pallas import tpu as pltpu


def _round_up(x, m):
    return ((x + m - 1) // m) * m


def atom_encoder_kernel(feat_ref, w1_ref, w2_ref, b_ref, out_ref, *,
                        G, C_pad, TR_pad, num_cat, offsets, compute_dtype,
                        precision):
    # feat_ref: [rt, G*C_pad]  packed compact slab; atom g of a group occupies
    #           columns [g*C_pad, (g+1)*C_pad): raw cat codes, scalars, zeros.
    # w1_ref:   [G*TR_pad, 128] block-wise stacked embedding tables
    #           (block g -> output lanes [g*emb_dim, (g+1)*emb_dim)).
    # w2_ref:   [G*C_pad, 128]  block-wise linear W (cat-code / pad rows = 0).
    # b_ref:    [1, 128]        linear bias, tiled G times along lanes.
    # out_ref:  [rt, 128]       packed embeddings (G atoms per row).
    feat = feat_ref[...]
    rt = feat.shape[0]

    # Linear part: the raw packed slab feeds the MXU directly; carrier-code and
    # padding columns hit zero weight rows so they contribute nothing.
    acc = jnp.dot(feat.astype(compute_dtype), w2_ref[...],
                  preferred_element_type=jnp.float32, precision=precision)

    # Embedding part: per-group multi-hot built in-kernel.  Compares are done in
    # f32 and restricted to TR_pad lanes (not the full output width).
    iota = jax.lax.broadcasted_iota(jnp.int32, (rt, TR_pad), 1).astype(jnp.float32)
    for g in range(G):                       # tiny static loops (G*num_cat cmps)
        match = None
        for i in range(num_cat):
            c0 = g * C_pad + i
            # Valid inputs satisfy 0 <= raw code < cat_dims[i] (torch Embedding
            # contract); out-of-range codes would silently mis-embed.
            code = feat[:, c0:c0 + 1].astype(jnp.float32) + float(offsets[i])
            hit = iota == code
            match = hit if match is None else (match | hit)
        onehot = jnp.where(match, 1.0, 0.0).astype(compute_dtype)
        acc += jnp.dot(onehot, w1_ref[g * TR_pad:(g + 1) * TR_pad, :],
                       preferred_element_type=jnp.float32, precision=precision)

    out_ref[...] = (acc + b_ref[...]).astype(out_ref.dtype)


def make_atom_encoder(emb_dim, feature_dims, sigma_embed_dim, key, *,
                      compute_dtype=jnp.float32, io_dtype=jnp.float32,
                      out_dtype=jnp.float32):
    """Builds deterministic params and returns (params, forward, num_cat, num_scalar)."""
    cat_dims = list(feature_dims[0])
    num_cat = len(cat_dims)
    num_scalar = feature_dims[1] + sigma_embed_dim
    total_rows = sum(cat_dims)

    assert num_cat >= 1 and num_scalar >= 1, "this instantiation needs both branches"
    assert 128 % emb_dim == 0, "packed-output path needs emb_dim | 128"
    G = 128 // emb_dim                       # atoms packed per 128-lane output row

    if jnp.dtype(io_dtype) == jnp.dtype(jnp.bfloat16):
        # Raw (un-offset) codes ride in the slab; integers <= 256 are exact in bf16.
        assert max(cat_dims) <= 256, "bf16 slab needs raw codes <= 256"

    C = num_cat + num_scalar
    C_pad = _round_up(C, 8)                  # compact per-atom slab width
    TR_pad = _round_up(total_rows, 8)        # per-block one-hot width

    keys = jax.random.split(key, num_cat + 2)

    tables = []
    for i, dim in enumerate(cat_dims):       # xavier-uniform, like the torch module
        a = math.sqrt(6.0 / (dim + emb_dim))
        tables.append(jax.random.uniform(keys[i], (dim, emb_dim), jnp.float32, -a, a))
    table = jnp.concatenate(tables, axis=0)

    bound = 1.0 / math.sqrt(num_scalar)      # PyTorch Linear default init
    w = jax.random.uniform(keys[num_cat], (num_scalar, emb_dim), jnp.float32, -bound, bound)
    b = jax.random.uniform(keys[num_cat + 1], (emb_dim,), jnp.float32, -bound, bound)

    # Block-wise fused weights: group position g owns output lanes
    # [g*emb_dim, (g+1)*emb_dim).  Both stay resident in VMEM (constant index_map).
    w1 = jnp.zeros((G * TR_pad, 128), jnp.float32)
    w2 = jnp.zeros((G * C_pad, 128), jnp.float32)
    for g in range(G):
        w1 = w1.at[g * TR_pad:g * TR_pad + total_rows,
                   g * emb_dim:(g + 1) * emb_dim].set(table)
        w2 = w2.at[g * C_pad + num_cat:g * C_pad + num_cat + num_scalar,
                   g * emb_dim:(g + 1) * emb_dim].set(w)
    bias128 = jnp.tile(b, (G,)).reshape(1, 128)   # bias stays f32 (post-accum add)

    offs, acc = [], 0
    for d in cat_dims:
        offs.append(acc)
        acc += d

    params = dict(table=table, w=w, b=b,
                  offsets=jnp.asarray(offs, jnp.int32),
                  w1=w1.astype(compute_dtype), w2=w2.astype(compute_dtype),
                  bias128=bias128)

    precision = (jax.lax.Precision.HIGHEST
                 if jnp.dtype(compute_dtype) == jnp.dtype(jnp.float32)
                 else jax.lax.Precision.DEFAULT)

    kernel = partial(atom_encoder_kernel, G=G, C_pad=C_pad, TR_pad=TR_pad,
                     num_cat=num_cat, offsets=tuple(offs),
                     compute_dtype=compute_dtype, precision=precision)

    def forward(x, params, *, rows_per_step=None):
        n = x.shape[0]
        n_groups = pl.cdiv(n, G)
        if rows_per_step is None:
            # >=2 balanced grid steps whenever possible (v7x megacore), capped at
            # ~2048 atoms per step; group-row tiles are multiples of 8 sublanes.
            rt = min(2048 // G, _round_up(max(pl.cdiv(n_groups, 2), 1), 8))
            rt = max(8, rt)
        else:
            rt = max(8, _round_up(rows_per_step, 8))
        num_steps = pl.cdiv(n_groups, rt)
        rows_pad = num_steps * rt
        atoms_pad = rows_pad * G

        # Compact slab straight from x (no multihot, no offset add, no concat of
        # a bias column): pad rows/cols, then a contiguous (free) reshape packs
        # G atoms per input row.
        feat = jnp.pad(x.astype(io_dtype), ((0, atoms_pad - n), (0, C_pad - C)))
        feat = feat.reshape(rows_pad, G * C_pad)

        cost = pl.CostEstimate(
            flops=2 * rows_pad * 128 * (G * TR_pad + G * C_pad),
            transcendentals=0,
            bytes_accessed=int(feat.size * feat.dtype.itemsize
                               + params["w1"].size * params["w1"].dtype.itemsize
                               + params["w2"].size * params["w2"].dtype.itemsize
                               + 128 * 4
                               + rows_pad * 128 * jnp.dtype(out_dtype).itemsize))

        out = pl.pallas_call(
            kernel,
            out_shape=jax.ShapeDtypeStruct((rows_pad, 128), out_dtype),
            grid=(num_steps,),
            in_specs=[
                pl.BlockSpec((rt, G * C_pad), lambda i: (i, 0)),    # atom tiles
                pl.BlockSpec((G * TR_pad, 128), lambda i: (0, 0)),  # resident tables
                pl.BlockSpec((G * C_pad, 128), lambda i: (0, 0)),   # resident linear W
                pl.BlockSpec((1, 128), lambda i: (0, 0)),           # packed bias
            ],
            out_specs=pl.BlockSpec((rt, 128), lambda i: (i, 0)),
            compiler_params=pltpu.CompilerParams(
                dimension_semantics=("parallel",),
                vmem_limit_bytes=32 * 1024 * 1024),
            cost_estimate=cost,
        )(feat, params["w1"], params["w2"], params["bias128"])

        # [rows_pad, 128] -> [atoms_pad, emb_dim] is contiguous, then drop pad rows.
        return out.reshape(atoms_pad, emb_dim)[:n]

    return params, forward, num_cat, num_scalar


def reference_forward(x, params, num_cat, num_scalar):
    cat_idx = x[:, :num_cat].astype(jnp.int32) + params["offsets"][None, :]
    emb = jnp.take(params["table"], cat_idx, axis=0).sum(axis=1)
    scal = x[:, num_cat:num_cat + num_scalar].astype(jnp.float32)
    return emb + scal @ params["w"] + params["b"][None, :]


if __name__ == "__main__":
    # Small, module-consistent configuration.
    emb_dim = 32
    feature_dims = ([5, 7, 3], 4)   # 3 categorical features, 4 raw scalars
    sigma_embed_dim = 4             # num_scalar_features = 8
    n_atoms = 40                    # -> 2 grid steps with the default tiling

    key = jax.random.PRNGKey(0)
    kparam, kcat, kscal = jax.random.split(key, 3)

    params, forward, num_cat, num_scalar = make_atom_encoder(
        emb_dim, feature_dims, sigma_embed_dim, kparam)

    # x = [N, num_cat + num_scalar], categorical codes stored as floats.
    cat_cols = jnp.stack(
        [jax.random.randint(jax.random.fold_in(kcat, i), (n_atoms,), 0, d)
         for i, d in enumerate(feature_dims[0])], axis=1).astype(jnp.float32)
    scal_cols = jax.random.normal(kscal, (n_atoms, num_scalar), jnp.float32)
    x = jnp.concatenate([cat_cols, scal_cols], axis=1)

    ref = reference_forward(x, params, num_cat, num_scalar)

    # f32 parity path (default tiling, >1 grid step, packed output, row padding).
    out = forward(x, params)
    jax.block_until_ready(out)
    assert out.shape == (n_atoms, emb_dim)
    assert jnp.allclose(out, ref, atol=1e-3, rtol=1e-3), \
        float(jnp.max(jnp.abs(out - ref)))

    # bf16 path (v6e/v7x): bf16 weights, HBM slab and output; f32 accumulation.
    params_bf, forward_bf, _, _ = make_atom_encoder(
        emb_dim, feature_dims, sigma_embed_dim, kparam,
        compute_dtype=jnp.bfloat16, io_dtype=jnp.bfloat16, out_dtype=jnp.bfloat16)
    out_bf = forward_bf(x, params_bf).astype(jnp.float32)
    jax.block_until_ready(out_bf)
    assert out_bf.shape == (n_atoms, emb_dim)
    assert jnp.allclose(out_bf, ref, atol=5e-2, rtol=5e-2), \
        float(jnp.max(jnp.abs(out_bf - ref)))

    print("KERNEL_OK")
</pallas_src>

<mosaic_0001>
module attributes {stable_mosaic.version = 11 : i64} {
  func.func @atom_encoder_kernel(%arg0: i32, %arg1: memref<8x64xf32, #tpu.memory_space<vmem>>, %arg2: memref<64x128xf32, #tpu.memory_space<vmem>>, %arg3: memref<64x128xf32, #tpu.memory_space<vmem>>, %arg4: memref<1x128xf32, #tpu.memory_space<vmem>>, %arg5: memref<8x128xf32, #tpu.memory_space<vmem>>) attributes {dimension_semantics = [#tpu.dimension_semantics<parallel>], iteration_bounds = array<i64: 2>, scalar_prefetch = 0 : i64, scratch_operands = 0 : i64, tpu.core_type = #tpu.core_type<tc>, window_params = [{transform_indices = @transform_0, window_bounds = array<i64: 8, 64>}, {pipeline_mode = #tpu.pipeline_mode<synchronous>, transform_indices = @transform_1, window_bounds = array<i64: 64, 128>}, {pipeline_mode = #tpu.pipeline_mode<synchronous>, transform_indices = @transform_2, window_bounds = array<i64: 64, 128>}, {pipeline_mode = #tpu.pipeline_mode<synchronous>, transform_indices = @transform_3, window_bounds = array<i64: 1, 128>}, {transform_indices = @transform_4, window_bounds = array<i64: 8, 128>}]} {
    %c0 = arith.constant 0 : index
    %c0_0 = arith.constant 0 : index
    %0 = vector.load %arg1[%c0, %c0_0] : memref<8x64xf32, #tpu.memory_space<vmem>>, vector<8x64xf32>
    %c0_1 = arith.constant 0 : index
    %c0_2 = arith.constant 0 : index
    %1 = vector.load %arg3[%c0_1, %c0_2] : memref<64x128xf32, #tpu.memory_space<vmem>>, vector<64x128xf32>
    %cst = arith.constant dense<0.000000e+00> : vector<8x128xf32>
    %2 = tpu.matmul %0, %1, %cst {dimension_numbers = #tpu.dot_dimension_numbers<[1], [0], [0], [1], [0, 0, 1, 1], [], []>, precision = #tpu.contract_precision<fp32>} : vector<8x64xf32>, vector<64x128xf32>, vector<8x128xf32> -> vector<8x128xf32>
    %3 = tpu.iota {dimensions = array<i32: 1>} : vector<8x16xi32>
    %4 = arith.sitofp %3 : vector<8x16xi32> to vector<8x16xf32>
    %5 = vector.extract_strided_slice %0 {offsets = [0, 0], sizes = [8, 1], strides = [1, 1]} : vector<8x64xf32> to vector<8x1xf32>
    %cst_3 = arith.constant 0.000000e+00 : f32
    %6 = vector.broadcast %cst_3 : f32 to vector<8x1xf32>
    %7 = arith.addf %5, %6 : vector<8x1xf32>
    %8 = vector.broadcast %7 : vector<8x1xf32> to vector<8x16xf32>
    %9 = arith.cmpf oeq, %4, %8 : vector<8x16xf32>
    %10 = vector.extract_strided_slice %0 {offsets = [0, 1], sizes = [8, 1], strides = [1, 1]} : vector<8x64xf32> to vector<8x1xf32>
    %cst_4 = arith.constant 5.000000e+00 : f32
    %11 = vector.broadcast %cst_4 : f32 to vector<8x1xf32>
    %12 = arith.addf %10, %11 : vector<8x1xf32>
    %13 = vector.broadcast %12 : vector<8x1xf32> to vector<8x16xf32>
    %14 = arith.cmpf oeq, %4, %13 : vector<8x16xf32>
    %15 = arith.ori %9, %14 : vector<8x16xi1>
    %16 = vector.extract_strided_slice %0 {offsets = [0, 2], sizes = [8, 1], strides = [1, 1]} : vector<8x64xf32> to vector<8x1xf32>
    %cst_5 = arith.constant 1.200000e+01 : f32
    %17 = vector.broadcast %cst_5 : f32 to vector<8x1xf32>
    %18 = arith.addf %16, %17 : vector<8x1xf32>
    %19 = vector.broadcast %18 : vector<8x1xf32> to vector<8x16xf32>
    %20 = arith.cmpf oeq, %4, %19 : vector<8x16xf32>
    %21 = arith.ori %15, %20 : vector<8x16xi1>
    %cst_6 = arith.constant 1.000000e+00 : f32
    %cst_7 = arith.constant 0.000000e+00 : f32
    %22 = vector.broadcast %cst_6 : f32 to vector<8x16xf32>
    %23 = vector.broadcast %cst_7 : f32 to vector<8x16xf32>
    %24 = arith.select %21, %22, %23 : vector<8x16xi1>, vector<8x16xf32>
    %c0_8 = arith.constant 0 : index
    %c0_9 = arith.constant 0 : index
    %25 = vector.load %arg2[%c0_8, %c0_9] : memref<64x128xf32, #tpu.memory_space<vmem>>, vector<16x128xf32>
    %cst_10 = arith.constant dense<0.000000e+00> : vector<8x128xf32>
    %26 = tpu.matmul %24, %25, %cst_10 {dimension_numbers = #tpu.dot_dimension_numbers<[1], [0], [0], [1], [0, 0, 1, 1], [], []>, precision = #tpu.contract_precision<fp32>} : vector<8x16xf32>, vector<16x128xf32>, vector<8x128xf32> -> vector<8x128xf32>
    %27 = arith.addf %2, %26 : vector<8x128xf32>
    %28 = vector.extract_strided_slice %0 {offsets = [0, 16], sizes = [8, 1], strides = [1, 1]} : vector<8x64xf32> to vector<8x1xf32>
    %cst_11 = arith.constant 0.000000e+00 : f32
    %29 = vector.broadcast %cst_11 : f32 to vector<8x1xf32>
    %30 = arith.addf %28, %29 : vector<8x1xf32>
    %31 = vector.broadcast %30 : vector<8x1xf32> to vector<8x16xf32>
    %32 = arith.cmpf oeq, %4, %31 : vector<8x16xf32>
    %33 = vector.extract_strided_slice %0 {offsets = [0, 17], sizes = [8, 1], strides = [1, 1]} : vector<8x64xf32> to vector<8x1xf32>
    %cst_12 = arith.constant 5.000000e+00 : f32
    %34 = vector.broadcast %cst_12 : f32 to vector<8x1xf32>
    %35 = arith.addf %33, %34 : vector<8x1xf32>
    %36 = vector.broadcast %35 : vector<8x1xf32> to vector<8x16xf32>
    %37 = arith.cmpf oeq, %4, %36 : vector<8x16xf32>
    %38 = arith.ori %32, %37 : vector<8x16xi1>
    %39 = vector.extract_strided_slice %0 {offsets = [0, 18], sizes = [8, 1], strides = [1, 1]} : vector<8x64xf32> to vector<8x1xf32>
    %cst_13 = arith.constant 1.200000e+01 : f32
    %40 = vector.broadcast %cst_13 : f32 to vector<8x1xf32>
    %41 = arith.addf %39, %40 : vector<8x1xf32>
    %42 = vector.broadcast %41 : vector<8x1xf32> to vector<8x16xf32>
    %43 = arith.cmpf oeq, %4, %42 : vector<8x16xf32>
    %44 = arith.ori %38, %43 : vector<8x16xi1>
    %cst_14 = arith.constant 1.000000e+00 : f32
    %cst_15 = arith.constant 0.000000e+00 : f32
    %45 = vector.broadcast %cst_14 : f32 to vector<8x16xf32>
    %46 = vector.broadcast %cst_15 : f32 to vector<8x16xf32>
    %47 = arith.select %44, %45, %46 : vector<8x16xi1>, vector<8x16xf32>
    %c16 = arith.constant 16 : index
    %c0_16 = arith.constant 0 : index
    %48 = vector.load %arg2[%c16, %c0_16] : memref<64x128xf32, #tpu.memory_space<vmem>>, vector<16x128xf32>
    %cst_17 = arith.constant dense<0.000000e+00> : vector<8x128xf32>
    %49 = tpu.matmul %47, %48, %cst_17 {dimension_numbers = #tpu.dot_dimension_numbers<[1], [0], [0], [1], [0, 0, 1, 1], [], []>, precision = #tpu.contract_precision<fp32>} : vector<8x16xf32>, vector<16x128xf32>, vector<8x128xf32> -> vector<8x128xf32>
    %50 = arith.addf %27, %49 : vector<8x128xf32>
    %51 = vector.extract_strided_slice %0 {offsets = [0, 32], sizes = [8, 1], strides = [1, 1]} : vector<8x64xf32> to vector<8x1xf32>
    %cst_18 = arith.constant 0.000000e+00 : f32
    %52 = vector.broadcast %cst_18 : f32 to vector<8x1xf32>
    %53 = arith.addf %51, %52 : vector<8x1xf32>
    %54 = vector.broadcast %53 : vector<8x1xf32> to vector<8x16xf32>
    %55 = arith.cmpf oeq, %4, %54 : vector<8x16xf32>
    %56 = vector.extract_strided_slice %0 {offsets = [0, 33], sizes = [8, 1], strides = [1, 1]} : vector<8x64xf32> to vector<8x1xf32>
    %cst_19 = arith.constant 5.000000e+00 : f32
    %57 = vector.broadcast %cst_19 : f32 to vector<8x1xf32>
    %58 = arith.addf %56, %57 : vector<8x1xf32>
    %59 = vector.broadcast %58 : vector<8x1xf32> to vector<8x16xf32>
    %60 = arith.cmpf oeq, %4, %59 : vector<8x16xf32>
    %61 = arith.ori %55, %60 : vector<8x16xi1>
    %62 = vector.extract_strided_slice %0 {offsets = [0, 34], sizes = [8, 1], strides = [1, 1]} : vector<8x64xf32> to vector<8x1xf32>
    %cst_20 = arith.constant 1.200000e+01 : f32
    %63 = vector.broadcast %cst_20 : f32 to vector<8x1xf32>
    %64 = arith.addf %62, %63 : vector<8x1xf32>
    %65 = vector.broadcast %64 : vector<8x1xf32> to vector<8x16xf32>
    %66 = arith.cmpf oeq, %4, %65 : vector<8x16xf32>
    %67 = arith.ori %61, %66 : vector<8x16xi1>
    %cst_21 = arith.constant 1.000000e+00 : f32
    %cst_22 = arith.constant 0.000000e+00 : f32
    %68 = vector.broadcast %cst_21 : f32 to vector<8x16xf32>
    %69 = vector.broadcast %cst_22 : f32 to vector<8x16xf32>
    %70 = arith.select %67, %68, %69 : vector<8x16xi1>, vector<8x16xf32>
    %c32 = arith.constant 32 : index
    %c0_23 = arith.constant 0 : index
    %71 = vector.load %arg2[%c32, %c0_23] : memref<64x128xf32, #tpu.memory_space<vmem>>, vector<16x128xf32>
    %cst_24 = arith.constant dense<0.000000e+00> : vector<8x128xf32>
    %72 = tpu.matmul %70, %71, %cst_24 {dimension_numbers = #tpu.dot_dimension_numbers<[1], [0], [0], [1], [0, 0, 1, 1], [], []>, precision = #tpu.contract_precision<fp32>} : vector<8x16xf32>, vector<16x128xf32>, vector<8x128xf32> -> vector<8x128xf32>
    %73 = arith.addf %50, %72 : vector<8x128xf32>
    %74 = vector.extract_strided_slice %0 {offsets = [0, 48], sizes = [8, 1], strides = [1, 1]} : vector<8x64xf32> to vector<8x1xf32>
    %cst_25 = arith.constant 0.000000e+00 : f32
    %75 = vector.broadcast %cst_25 : f32 to vector<8x1xf32>
    %76 = arith.addf %74, %75 : vector<8x1xf32>
    %77 = vector.broadcast %76 : vector<8x1xf32> to vector<8x16xf32>
    %78 = arith.cmpf oeq, %4, %77 : vector<8x16xf32>
    %79 = vector.extract_strided_slice %0 {offsets = [0, 49], sizes = [8, 1], strides = [1, 1]} : vector<8x64xf32> to vector<8x1xf32>
    %cst_26 = arith.constant 5.000000e+00 : f32
    %80 = vector.broadcast %cst_26 : f32 to vector<8x1xf32>
    %81 = arith.addf %79, %80 : vector<8x1xf32>
    %82 = vector.broadcast %81 : vector<8x1xf32> to vector<8x16xf32>
    %83 = arith.cmpf oeq, %4, %82 : vector<8x16xf32>
    %84 = arith.ori %78, %83 : vector<8x16xi1>
    %85 = vector.extract_strided_slice %0 {offsets = [0, 50], sizes = [8, 1], strides = [1, 1]} : vector<8x64xf32> to vector<8x1xf32>
    %cst_27 = arith.constant 1.200000e+01 : f32
    %86 = vector.broadcast %cst_27 : f32 to vector<8x1xf32>
    %87 = arith.addf %85, %86 : vector<8x1xf32>
    %88 = vector.broadcast %87 : vector<8x1xf32> to vector<8x16xf32>
    %89 = arith.cmpf oeq, %4, %88 : vector<8x16xf32>
    %90 = arith.ori %84, %89 : vector<8x16xi1>
    %cst_28 = arith.constant 1.000000e+00 : f32
    %cst_29 = arith.constant 0.000000e+00 : f32
    %91 = vector.broadcast %cst_28 : f32 to vector<8x16xf32>
    %92 = vector.broadcast %cst_29 : f32 to vector<8x16xf32>
    %93 = arith.select %90, %91, %92 : vector<8x16xi1>, vector<8x16xf32>
    %c48 = arith.constant 48 : index
    %c0_30 = arith.constant 0 : index
    %94 = vector.load %arg2[%c48, %c0_30] : memref<64x128xf32, #tpu.memory_space<vmem>>, vector<16x128xf32>
    %cst_31 = arith.constant dense<0.000000e+00> : vector<8x128xf32>
    %95 = tpu.matmul %93, %94, %cst_31 {dimension_numbers = #tpu.dot_dimension_numbers<[1], [0], [0], [1], [0, 0, 1, 1], [], []>, precision = #tpu.contract_precision<fp32>} : vector<8x16xf32>, vector<16x128xf32>, vector<8x128xf32> -> vector<8x128xf32>
    %96 = arith.addf %73, %95 : vector<8x128xf32>
    %c0_32 = arith.constant 0 : index
    %c0_33 = arith.constant 0 : index
    %97 = vector.load %arg4[%c0_32, %c0_33] : memref<1x128xf32, #tpu.memory_space<vmem>>, vector<1x128xf32>
    %98 = vector.broadcast %97 : vector<1x128xf32> to vector<8x128xf32>
    %99 = arith.addf %96, %98 : vector<8x128xf32>
    %c0_34 = arith.constant 0 : index
    %c0_35 = arith.constant 0 : index
    %100 = vector.load %arg5[%c0_34, %c0_35] : memref<8x128xf32, #tpu.memory_space<vmem>>, vector<8x128xf32>
    tpu.vector_store %arg5[%c0_34, %c0_35], %99 {strides = array<i32>} : memref<8x128xf32, #tpu.memory_space<vmem>>, vector<8x128xf32>,
    return
  }
  func.func @transform_0(%arg0: i32) -> (i32, i32) {
    %c0_i32 = arith.constant 0 : i32
    %c0_i32_0 = arith.constant 0 : i32
    return %arg0, %c0_i32 : i32, i32
  }
  func.func @transform_1(%arg0: i32) -> (i32, i32) {
    %c0_i32 = arith.constant 0 : i32
    %c0_i32_0 = arith.constant 0 : i32
    %c0_i32_1 = arith.constant 0 : i32
    return %c0_i32, %c0_i32_0 : i32, i32
  }
  func.func @transform_2(%arg0: i32) -> (i32, i32) {
    %c0_i32 = arith.constant 0 : i32
    %c0_i32_0 = arith.constant 0 : i32
    %c0_i32_1 = arith.constant 0 : i32
    return %c0_i32, %c0_i32_0 : i32, i32
  }
  func.func @transform_3(%arg0: i32) -> (i32, i32) {
    %c0_i32 = arith.constant 0 : i32
    %c0_i32_0 = arith.constant 0 : i32
    %c0_i32_1 = arith.constant 0 : i32
    return %c0_i32, %c0_i32_0 : i32, i32
  }
  func.func @transform_4(%arg0: i32) -> (i32, i32) {
    %c0_i32 = arith.constant 0 : i32
    %c0_i32_0 = arith.constant 0 : i32
    return %arg0, %c0_i32 : i32, i32
  }
}

</mosaic_0001>

<bundles_post_ra>
// kernel: tpu_custom_call.1
= control target key start
LH: loop header
LB: loop body
LE: loop exit
PB: predicated region body
PF: predicated region fallthrough
CT: control target
= control target key end

     0   :  { %9 = vsyncpa [#allocation3], 0  ;;  %s2129_s0 = inlined_call_operand.hbm [shape: f32[16,64], index: 0, kind: input, shape index: {}]   ;;  %s2130_s1 = inlined_call_operand.hbm [shape: f32[64,128], index: 1, kind: input, shape index: {}]   ;;  %s2131_s2 = inlined_call_operand.hbm [shape: f32[64,128], index: 2, kind: input, shape index: {}]   ;;  %s2132_s3 = inlined_call_operand.vmem [shape: f32[1,128], index: 3, kind: input, shape index: {}]   ;;  %s2133_s4 = inlined_call_operand.hbm [shape: f32[16,128], index: 4, kind: output, shape index: {}]  }
   0x1   :  { %11 = vsyncpa [#allocation3 + $0x1], 0 }
   0x2   :  { %12 = vsyncpa [#allocation6], 0 }
   0x3   :  { %13 = vsyncpa [#allocation4], 0 }
   0x4   :  { %15 = vsyncpa [#allocation4 + $0x1], 0  ;;  %s1678_s15 = smov 0   ;;  %s1680_s16 = smov 0  }
   0x5   :  { %s1682_s17 = smov 0   ;;  %s1684_s18 = smov 0  }
   0x6 LB: > { %s152_s21 = sshll.u32 %s2130_s1, 4  ;;  %s1702_s22 = sadd.s32 4294967295, %s1634_s18   ;;  %s1634_s18 = sphi %s1684_s18, %s2144_s18   ;;  %s1630_s17 = sphi %s1682_s17, %s2143_s17   ;;  %s1626_s16 = sphi %s1680_s16, %s2142_s16   ;;  %s1622_s15 = sphi %s1678_s15, %s2141_s15   ;;  %s153_s21 = int_to_ptr.hbm [resolvable:$true] %s152_s21 }
   0x7   : > { %p1351_p0 = scmp.ge.s32.totalorder %s1634_s18, 1  ;;  %p42_p1 = scmp.eq.s32.totalorder %s1702_s22, 0 }
   0x8   : > { %p141_p2 = scmp.lt.s32.totalorder %s1634_s18, 3  ;;  %s1636_s24 = smov [#allocation5]  }
   0x9   : > { %s154_s25 = sshll.u32 %s1636_s24, 4  ;;  %s166_s28 = sshll.u32 %s2131_s2, 4  ;;  %s155_s25 = int_to_ptr.vmem [resolvable:$true] %s154_s25  ;;  %s167_s28 = int_to_ptr.hbm [resolvable:$true] %s166_s28 }
   0xa   : > { %p1707_p3 = pnand %p1351_p0, %p141_p2  ;;  %s1637_s29 = smov [#allocation7]  }
   0xb   : > { %s168_s30 = sshll.u32 %s1637_s29, 4  ;;  %s1638_s5 = smov 128   ;;  %s169_s30 = int_to_ptr.vmem [resolvable:$true] %s168_s30 }
   0xc   : > { %p1390_p4 = pneg %p1707_p3  ;;  %s1639_s6 = smov 8  }
   0xd   : > { %s1350_s7 = sadd.s32 4294967294, %s1634_s18   ;;  %s1721_s8 = sadd.s32 1, %s1634_s18  }
   0xe   : > { %p1391_p6 = pnand %p1390_p4, %p42_p1  ;;  %s25_s9 = ssub.s32 %s1634_s18, %s1721_s8 }
   0xf   : > { %s28_s10 = sadd.s32 1, %s1630_s17  ;;  %p26_p7 = scmp.eq.s32.totalorder %s25_s9, 0 }
  0x10   : > { %1393 = dma.hbm_to_vmem [thread:$0]  (!%p1391_p6), %s153_s21, 1024, %s155_s25, [#allocation6], %s1638_s5, %s1638_s5, %s1639_s6  }
  0x11   : > { %1396 = dma.hbm_to_vmem [thread:$0]  (!%p1391_p6), %s167_s28, 1024, %s169_s30, [#allocation6], %s1638_s5, %s1638_s5, %s1639_s6  }
  0x12   : > { %p35_p8 = scmp.ne.s32.totalorder %s1630_s17, %s1626_s16  ;;  %p36_p9 = scmp.eq.s32.totalorder %s1634_s18, 0 }
  0x13   : > { %p41_p10 = scmp.ne.s32.totalorder %s1626_s16, %s1622_s15  ;;  %p128_p13 = scmp.eq.s32.totalorder %s1702_s22, 1 }
  0x14   : > { %s1732_s11 = scalar_select %p26_p7, %s1630_s17, %s28_s10  }
  0x15   : > { %p1734_p11 = por %p36_p9, %p35_p8  ;;  %p1740_p12 = por %p42_p1, %p41_p10 }
  0x16   : > { %p134_p0 = scmp.eq.s32.totalorder %s1350_s7, 1  ;;  %p1407_p2 = scmp.lt.s32.totalorder %s1634_s18, 2 }
  0x17   : > { %s185_s14 = sand.u32 1, %s1630_s17   ;;  %p1747_p4 = por %p128_p13, %p35_p8 }
  0x18   : > { %p1751_p6 = por %p134_p0, %p41_p10  ;;  %s1355_s21 = sshll.u32 %s185_s14, 3 }
  0x19   : > { %s1356_s24 = sshll.u32 %s1634_s18, 3  ;;  %s189_s28 = scalar_lea.vmem [#allocation2], %s1355_s21 }
  0x1a   : > { %s193_s27 = scalar_lea.hbm %s2129_s0, %s1356_s24  ;;  %s197_s29 = sshll.u32 %s189_s28, 4  ;;  %s198_s29 = int_to_ptr.vmem [resolvable:$true] %s197_s29 }
  0x1b   : > { %s195_s30 = sshll.u32 %s193_s27, 4  ;;  %p1761_p7 = pnand %p1407_p2, %p1734_p11  ;;  %s196_s30 = int_to_ptr.hbm [resolvable:$true] %s195_s30 }
  0x1c   : > { %s186_s6 = scalar_lea.sflag [#allocation3], %s185_s14  ;;  %s1534_s7 = sshra.s32 %s196_s30, 4  ;;  %s1535_s7 = int_to_ptr.hbm [resolvable:$true] %s1534_s7 }
  0x1d   : > { %s1536_s9 = scalar_lea.hbm %s1535_s7, 8  ;;  %p1538_p9 = pneg %p1761_p7 }
  0x1e   : > { %p1537_p8 = scmp.ne.s32.totalorder %s1535_s7, %s1536_s9  ;;  %s1541_s24 = scalar_lea.hbm %s2129_s0, 16 }
  0x1f   : > { %p1542_p11 = scmp.lt.s32.totalorder %s1535_s7, %s2129_s0  ;;  %p1543_p0 = scmp.lt.s32.totalorder %s1541_s24, %s1536_s9 }
  0x20   : > { %p1539_p10 = pnand %p1538_p9, %p1537_p8 }
  0x21   : > { %p1544_p2 = por %p1543_p0, %p1542_p11 }
  0x22   : > { %p1540_p13 = pneg %p1539_p10 }
  0x24   : > { %p1545_p5 = pnand %p1544_p2, %p1540_p13 }
  0x26   : > { %1548 = shalt.err (!%p1545_p5)
}
  0x27   : > { %1400 = dma.hbm_to_vmem [thread:$0]  (!%p1761_p7), %s196_s30, 128, %s198_s29, %s186_s6  }
  0x28   : > { %206 = sbr.rel (%p1707_p3) target bundleno = 386 (0x182), region = 36  ;;  %s1778_s14 = sand.u32 (!%p1707_p3), 1, %s1626_s16  }
  0x29   : > { %s1358_s26 = sshll.u32 (!%p1707_p3), %s1778_s14, 3  ;;  %s209_s27 = scalar_lea.sflag (!%p1707_p3), [#allocation3], %s1778_s14 }
  0x2a   : > { %s212_s28 = scalar_lea.vmem (!%p1707_p3), [#allocation2], %s1358_s26 }
  0x2d   : > { %1609 = dma.done.wait (%p1740_p12), %s209_s27, 128  }
  0x2e   : > { %1611 = vsyncadd (%p1740_p12), %s209_s27, 4294967168 }
  0x2f   : > { %1613 = dma.done.wait (%p42_p1), [#allocation6], 2048  }
  0x30   : > { %1615 = vsyncadd (%p42_p1), [#allocation6], 4294965248  ;;  %v1640_v0 = vmov 0   ;;  %v1641_v1 = vmov 2   ;;  %v1642_v2 = vmov 17   ;;  %v1792_v3 = vld [vmem:[%s212_s28] sm:$0xff] }
  0x31   : > { %1460 = vset.pattern.permute.xlu0 %v1640_v0  ;;  %1462 = vset.pattern.permute.xlu1 %v1641_v1  ;;  %v275_v4 = vadd.f32 12.0, %v1792_v3  ;;  %v267_v5 = vadd.f32 5.0, %v1792_v3  ;;  %v285_v6 = vld [vmem:[#allocation5 + $0x8] sm:$0xff]  ;;  %v1643_v8 = vmov 1   ;;  %v1644_v10 = vmov 16   ;;  %v256_v18 = vld [vmem:[#allocation7 + $0x38] sm:$0xff] }
  0x32   : > { %1464 = vset.pattern.permute.xlu2 %v1642_v2  ;;  %263 = vperm.xlu0 %1460, %v1792_v3   ;;  %v1797_v7 = vand.u32 4294901760, %v285_v6  ;;  %v1645_v11 = vmov 18   ;;  %v1646_v12 = vmov 34   ;;  %v1647_v13 = vmov 32   ;;  %v255_v20 = vld [vmem:[#allocation7 + $0x30] sm:$0xff]  ;;  %v284_v21 = vld [vmem:[#allocation5] sm:$0xff] }
  0x33   : > { %278 = vperm.xlu1 %1462, %v275_v4   ;;  %696 = vperm.xlu2 %1464, %v267_v5   ;;  %v1648_v14 = vmov 33   ;;  %v1649_v15 = vmov 50   ;;  %v1650_v16 = vmov 48   ;;  %v1651_v17 = vmov 49   ;;  %v254_v25 = vld [vmem:[#allocation7 + $0x28] sm:$0xff]  ;;  %v253_v30 = vld [vmem:[#allocation7 + $0x20] sm:$0xff] }
  0x34   : > { %v332_v9 = vsub.f32 %v285_v6, %v1797_v7  ;;  %389 = vmatpush.msra.mxu3 %v1797_v7  ;;  %305 = vmatpush.msra.mxu0 %v1797_v7  ;;  %v1805_v19 = vand.u32 4294901760, %v256_v18  ;;  %v1807_v22 = vand.u32 4294901760, %v255_v20  ;;  %v1812_v24 = vand.u32 4294901760, %v284_v21  ;;  %v252_v36 = vld [vmem:[#allocation7 + $0x18] sm:$0xff]  ;;  %v251_v43 = vld [vmem:[#allocation7 + $0x10] sm:$0xff]  ;;  %v250_v51 = vld [vmem:[#allocation7 + $0x8] sm:$0xff] }
  0x35   : > { %v1815_v27 = vand.u32 4294901760, %v254_v25  ;;  %v1827_v34 = vand.u32 4294901760, %v253_v30  ;;  %v1836_v40 = vand.u32 4294901760, %v252_v36  ;;  %v1843_v47 = vand.u32 4294901760, %v251_v43  ;;  %v249_v58 = vld [vmem:[#allocation7] sm:$0xff]  ;;  %s1375_s23 = sshll.u32 %s1702_s22, 3 }
  0x36   : > { %364 = vmatpush.msra.mxu2 %v332_v9  ;;  %v1810_v23 = vsub.f32 %v256_v18, %v1805_v19  ;;  %v1818_v28 = vsub.f32 %v255_v20, %v1807_v22  ;;  %v338_v29 = vsub.f32 %v284_v21, %v1812_v24  ;;  %391 = vmatpush.msra.mxu3 %v1812_v24  ;;  %v333_v33 = vand.u32 4294901760, %v332_v9  ;;  %s1256_s30 = scalar_lea.hbm %s2133_s4, %s1375_s23  ;;  %s247_s22 = scalar_lea.vmem [#allocation8], %s1358_s26 }
  0x37   : > { %307 = vmatpush.msra.mxu0 %v1812_v24  ;;  %v1830_v35 = vsub.f32 %v254_v25, %v1815_v27  ;;  %v1840_v42 = vsub.f32 %v253_v30, %v1827_v34  ;;  %v1850_v50 = vsub.f32 %v252_v36, %v1836_v40  ;;  %v1853_v53 = vand.u32 4294901760, %v250_v51  ;;  %s1258_s7 = sshll.u32 %s247_s22, 4  ;;  %s1260_s9 = sshll.u32 %s1256_s30, 4  ;;  %s1259_s7 = int_to_ptr.vmem [resolvable:$true] %s1258_s7  ;;  %s1261_s9 = int_to_ptr.hbm [resolvable:$true] %s1260_s9 }
  0x38   : > { %v496_v26 = vand.u32 4294901760, %v1810_v23  ;;  %v502_v32 = vand.u32 4294901760, %v1818_v28  ;;  %367 = vmatpush.msra.mxu2 %v338_v29  ;;  %v334_v39 = vsub.f32 %v332_v9, %v333_v33  ;;  %v339_v46 = vand.u32 4294901760, %v338_v29  ;;  %s1246_s10 = scalar_lea.sflag [#allocation4], %s1778_s14  ;;  %s1578_s21 = sshra.s32 %s1261_s9, 4  ;;  %s1579_s21 = int_to_ptr.hbm [resolvable:$true] %s1578_s21 }
  0x39   : > { %416 = vmatpush.msrb.mxu0 %v333_v33  ;;  %v508_v41 = vand.u32 4294901760, %v1830_v35  ;;  %v514_v49 = vand.u32 4294901760, %v1840_v42  ;;  %v1856_v54 = vsub.f32 %v251_v43, %v1843_v47  ;;  %v520_v57 = vand.u32 4294901760, %v1850_v50  ;;  %s1580_s24 = scalar_lea.hbm %s1579_s21, 8  ;;  %s1584_s27 = scalar_lea.hbm %s2133_s4, 16 }
  0x3a   : > { %1461 = vset.pattern.permute.xlu0 %v1643_v8  ;;  %v497_v31 = vsub.f32 %v1810_v23, %v496_v26  ;;  %462 = vmatpush.msrb.mxu2 %v1805_v19  ;;  %v503_v38 = vsub.f32 %v1818_v28, %v502_v32  ;;  %v335_v45 = vand.u32 4294901760, %v334_v39  ;;  %v340_v52 = vsub.f32 %v338_v29, %v339_v46  ;;  %v708_v39 = vld [vmem:[#allocation5 + $0x10] sm:$0xff]  ;;  %p1581_p1 = scmp.ne.s32.totalorder %s1579_s21, %s1580_s24  ;;  %p1585_p12 = scmp.lt.s32.totalorder %s1579_s21, %s2133_s4 }
  0x3b   : > { %270 = vperm.xlu0 %1461, %v267_v5   ;;  %1463 = vset.pattern.permute.xlu1 %v1644_v10  ;;  %v509_v48 = vsub.f32 %v1830_v35, %v508_v41  ;;  %v515_v56 = vsub.f32 %v1840_v42, %v514_v49  ;;  %v526_v60 = vand.u32 4294901760, %v1856_v54  ;;  %v1864_v61 = vand.u32 4294901760, %v249_v58  ;;  %p1586_p7 = scmp.lt.s32.totalorder %s1584_s27, %s1580_s24 }
  0x3c   : > { %1465 = vset.pattern.permute.xlu2 %v1645_v11  ;;  %691 = vperm.xlu1 %1463, %v1792_v3   ;;  %v498_v37 = vand.u32 4294901760, %v497_v31  ;;  %v504_v44 = vand.u32 4294901760, %v503_v38  ;;  %v341_v59 = vand.u32 4294901760, %v340_v52  ;;  %v1867_v62 = vsub.f32 %v250_v51, %v1853_v53  ;;  %v709_v31 = vld [vmem:[#allocation5 + $0x18] sm:$0xff]  ;;  %p1582_p3 = pnand %p1581_p1, %p1747_p4 }
  0x3d   : > { %702 = vperm.xlu2 %1465, %v275_v4   ;;  %464 = vmatpush.msrb.mxu2 %v1807_v22  ;;  %v510_v55 = vand.u32 4294901760, %v509_v48  ;;  %v516_v63 = vand.u32 4294901760, %v515_v56  ;;  %v521_v0 = vsub.f32 %v1850_v50, %v520_v57  ;;  %v527_v1 = vsub.f32 %v1856_v54, %v526_v60  ;;  %p1587_p8 = por %p1586_p7, %p1585_p12 }
  0x3e   : > { %499 = vmatpush.msrb.mxu3 %v498_v37  ;;  %336 = vmatpush.msra.mxu1 %v335_v45  ;;  %v532_v2 = vand.u32 4294901760, %v1867_v62  ;;  %vm449_vm0 = vcmask 523264   ;;  %vm286_vm5 = vcmask 130048   ;;  %v1652_v29 = vmov 0.0   ;;  %p1583_p5 = pneg %p1582_p3 }
  0x3f   : > { %466 = vmatpush.msrb.mxu2 %v1815_v27  ;;  %420 = vmatpush.msrb.mxu0 %v339_v46  ;;  %v528_v6 = vand.u32 4294901760, %v527_v1  ;;  %v1912_v38 = vand.u32 4294901760, %v709_v31  ;;  %v1919_v46 = vand.u32 4294901760, %v708_v39 }
  0x40   : > { %505 = vmatpush.msrb.mxu3 %v504_v44  ;;  %342 = vmatpush.msra.mxu1 %v341_v59  ;;  %v533_v8 = vsub.f32 %v1867_v62, %v532_v2  ;;  %p1588_p9 = pnand %p1587_p8, %p1583_p5 }
  0x41   : > { %468 = vmatpush.msrb.mxu2 %v1827_v34 }
  0x42   : > { %511 = vmatpush.msrb.mxu3 %v510_v55  ;;  %441 = vmatpush.msrb.mxu1 %v1797_v7  ;;  %v534_v10 = vand.u32 4294901760, %v533_v8 }
  0x43   : > { %1468 = vset.pattern.permute.xlu0 %v1646_v12  ;;  %470 = vmatpush.msrb.mxu2 %v1836_v40  ;;  %v257_v12 = vlaneseq }
  0x44   : > { %885 = vperm.xlu0 %1468, %v275_v4   ;;  %1466 = vset.pattern.permute.xlu1 %v1647_v13 }
  0x45   : > { %1467 = vset.pattern.permute.xlu2 %v1648_v14  ;;  %874 = vperm.xlu1 %1466, %v1792_v3   ;;  %v258_v14 = vand.u32 127, %v257_v12 }
  0x46   : > { %879 = vperm.xlu2 %1467, %v267_v5   ;;  %517 = vmatpush.msrb.mxu3 %v516_v63 }
  0x47   : > { %472 = vmatpush.msrb.mxu2 %v1843_v47  ;;  %443 = vmatpush.msrb.mxu1 %v1812_v24  ;;  %v1893_v18 = vcvt.s32.f32 %v258_v14 }
  0x49   : > { %474 = vmatpush.msrb.mxu2 %v1853_v53 }
  0x4b   : > { %476 = vmatpush.msrb.mxu2 %v1864_v61 }
  0x4c   : > { %1472 = vset.pattern.permute.xlu0 %v1649_v15 }
  0x4d   : > { %1469 = vset.pattern.permute.xlu1 %v1650_v16 }
  0x4e   : > { %1470 = vset.pattern.permute.xlu2 %v1651_v17  ;;  %1057 = vperm.xlu1 %1469, %v1792_v3   ;;  %v451_v17 = vsel %vm449_vm0, %v1792_v3, 0 }
  0x4f   : > { %1062 = vperm.xlu2 %1470, %v267_v5   ;;  %v522_v5 = vand.u32 4294901760, %v521_v0  ;;  %v1895_v20 = vand.u32 4294901760, %v451_v17  ;;  %v1074_v0 = vld [vmem:[#allocation5 + $0x30] sm:$0xff] }
  0x51   : > { %523 = vmatpush.msrb.mxu3 %v522_v5  ;;  %v1901_v24 = vsub.f32 %v451_v17, %v1895_v20 }
  0x53   : > { %529 = vmatpush.msrb.mxu3 %v528_v6  ;;  %v479_v36 = vand.u32 4294901760, %v1901_v24 }
  0x55   : > { %535 = vmatpush.msrb.mxu3 %v534_v10  ;;  %v480_v44 = vsub.f32 %v1901_v24, %v479_v36 }
  0x56   : > { %1471 = vset.pattern.permute.xlu1 %v1649_v15 }
  0x57   : > { %1068 = vperm.xlu1 %1471, %v275_v4   ;;  %v1878_v4 = vsub.f32 %v249_v58, %v1864_v61  ;;  %v481_v55 = vand.u32 4294901760, %v480_v44  ;;  %v1075_v58 = vld [vmem:[#allocation5 + $0x38] sm:$0xff] }
  0x59   : > { %v538_v9 = vand.u32 4294901760, %v1878_v4 }
  0x5b   : > { %v539_v7 = vsub.f32 %v1878_v4, %v538_v9 }
  0x5d   : > { %v540_v11 = vand.u32 4294901760, %v539_v7 }
  0x5f   : > { %541 = vmatpush.msrb.mxu3 %v540_v11 }
  0x8d   : > { %v697_v16 = vpop.permute.xlu2 %696 }
  0x8e   : > { %vm699_vm7 = vcmp.eq.f32.partialorder %v1893_v18, %v697_v16 }
  0x97   : > { %v703_v30 = vpop.permute.xlu2 %702 }
  0x98   : > { %vm705_vm10 = vcmp.eq.f32.partialorder %v1893_v18, %v703_v30 }
  0xa0   : > { %v880_v52 = vpop.permute.xlu2 %879 }
  0xa1   : > { %vm882_vm13 = vcmp.eq.f32.partialorder %v1893_v18, %v880_v52 }
  0xa4   : > { %v264_v13 = vpop.permute.xlu0 %263 }
  0xa5   : > { %v279_v15 = vpop.permute.xlu1 %278  ;;  %vm266_vm2 = vcmp.eq.f32.partialorder %v1893_v18, %v264_v13 }
  0xa6   : > { %vm281_vm1 = vcmp.eq.f32.partialorder %v1893_v18, %v279_v15 }
  0xa9   : > { %v1063_v63 = vpop.permute.xlu2 %1062 }
  0xaa   : > { %vm1065_vm15 = vcmp.eq.f32.partialorder %v1893_v18, %v1063_v63 }
  0xad   : > { %v271_v21 = vpop.permute.xlu0 %270 }
  0xae   : > { %vm273_vm3 = vcmp.eq.f32.partialorder %v1893_v18, %v271_v21  ;;  %v692_v25 = vpop.permute.xlu1 %691 }
  0xaf   : > { %vm274_vm4 = vmor %vm266_vm2, %vm273_vm3  ;;  %vm694_vm8 = vcmp.eq.f32.partialorder %v1893_v18, %v692_v25 }
  0xb0   : > { %vm282_vm6 = vmor %vm274_vm4, %vm281_vm1 }
  0xb1   : > { %v1904_v3 = vsel %vm282_vm6, 1.0, %v1652_v29  ;;  %vm700_vm9 = vmor %vm694_vm8, %vm699_vm7 }
  0xb2   : > { %1362 = vmatmul.msk.f32.vlgmr.msra.gmra.mxu1 %vm286_vm5, %v1904_v3  ;;  %v288_v33 = vsel %vm286_vm5, %v1904_v3, 0  ;;  %vm706_vm11 = vmor %vm700_vm9, %vm705_vm10 }
  0xb3   : > { %594 = vmatpush.msra.mxu1 %v1805_v19  ;;  %v309_v37 = vsub.f32 %v288_v33, %v288_v33 }
  0xb5   : > { %370 = vmatmul.f32.vlgmr.msra.gmra.mxu2 %v309_v37  ;;  %596 = vmatpush.msra.mxu1 %v1807_v22  ;;  %v310_v43 = vand.u32 4294901760, %v309_v37 }
  0xb6   : > { %627 = vmatpush.msra.mxu2 %v496_v26  ;;  %v1929_v26 = vsub.f32 %v709_v31, %v1912_v38 }
  0xb7   : > { %395 = vmatmul.f32.vlgmr.msra.gmra.mxu3 %v310_v43  ;;  %598 = vmatpush.msra.mxu1 %v1815_v27  ;;  %v311_v45 = vsub.f32 %v309_v37, %v310_v43  ;;  %v1926_v48 = vpop.permute.xlu1 %874 }
  0xb8   : > { %631 = vmatpush.msra.mxu2 %v502_v32  ;;  %670 = vmatpush.msra.mxu3 %v1805_v19  ;;  %v1939_v19 = vsub.f32 %v708_v39, %v1919_v46  ;;  %v892_v32 = vld [vmem:[#allocation5 + $0x28] sm:$0xff]  ;;  %v756_v56 = vand.u32 4294901760, %v1929_v26  ;;  %vm877_vm12 = vcmp.eq.f32.partialorder %v1893_v18, %v1926_v48 }
  0xb9   : > { %600 = vmatpush.msra.mxu1 %v1827_v34  ;;  %v312_v51 = vand.u32 4294901760, %v311_v45  ;;  %vm883_vm0 = vmor %vm877_vm12, %vm882_vm13 }
  0xba   : > { %1364 = vmatmul.msk.f32.vlgmr.msrb.gmra.mxu1 %vm286_vm5, %v1904_v3  ;;  %635 = vmatpush.msra.mxu2 %v508_v41  ;;  %v891_v41 = vld [vmem:[#allocation5 + $0x20] sm:$0xff] }
  0xbb   : > { %672 = vmatpush.msra.mxu3 %v1807_v22  ;;  %313 = vmatmul.f32.vlgmr.msra.gmra.mxu0 %v312_v51  ;;  %v1948_v22 = vand.u32 4294901760, %v892_v32 }
  0xbc   : > { %602 = vmatpush.msra.mxu1 %v1836_v40  ;;  %557 = vmatpush.msra.mxu0 %v1810_v23  ;;  %v762_v23 = vand.u32 4294901760, %v1939_v19 }
  0xbd   : > { %639 = vmatpush.msra.mxu2 %v514_v49  ;;  %674 = vmatpush.msra.mxu3 %v1815_v27  ;;  %v757_v27 = vsub.f32 %v1929_v26, %v756_v56  ;;  %v1958_v49 = vsel %vm706_vm11, 1.0, %v1652_v29 }
  0xbe   : > { %482 = vmatmul.f32.vlgmr.msrb.gmra.mxu2 %v481_v55  ;;  %604 = vmatpush.msra.mxu1 %v1843_v47  ;;  %v763_v59 = vsub.f32 %v1939_v19, %v762_v23 }
  0xbf   : > { %560 = vmatpush.msra.mxu0 %v1818_v28  ;;  %643 = vmatpush.msra.mxu2 %v520_v57  ;;  %v1968_v57 = vand.u32 4294901760, %v891_v41 }
  0xc0   : > { %676 = vmatpush.msra.mxu3 %v1827_v34  ;;  %606 = vmatpush.msra.mxu1 %v1853_v53  ;;  %v1058_v28 = vpop.permute.xlu1 %1057  ;;  %v1966_v34 = vsub.f32 %v892_v32, %v1948_v22  ;;  %v764_v5 = vand.u32 4294901760, %v763_v59 }
  0xc1   : > { %543 = vmatmul.f32.vlgmr.msrb.gmra.mxu3 %v1895_v20  ;;  %563 = vmatpush.msra.mxu0 %v1830_v35  ;;  %v711_v35 = vsel %vm286_vm5, %v1958_v49, 0  ;;  %vm1060_vm14 = vcmp.eq.f32.partialorder %v1893_v18, %v1058_v28  ;;  %v1991_v1 = vsub.f32 %v891_v41, %v1968_v57 }
  0xc2   : > { %647 = vmatpush.msra.mxu2 %v526_v60  ;;  %678 = vmatpush.msra.mxu3 %v1836_v40  ;;  %v758_v40 = vand.u32 4294901760, %v757_v27  ;;  %v1977_v60 = vand.u32 4294901760, %v1075_v58  ;;  %vm1066_vm2 = vmor %vm1060_vm14, %vm1065_vm15 }
  0xc3   : > { %608 = vmatpush.msra.mxu1 %v1864_v61  ;;  %566 = vmatpush.msra.mxu0 %v1840_v42  ;;  %v886_v42 = vpop.permute.xlu0 %885  ;;  %v945_v8 = vand.u32 4294901760, %v1991_v1 }
  0xc4   : > { %612 = vmatmul.f32.vlgmr.msra.gmra.mxu1 %v479_v36  ;;  %651 = vmatpush.msra.mxu2 %v532_v2  ;;  %v1994_v2 = vsub.f32 %v711_v35, %v711_v35  ;;  %vm888_vm1 = vcmp.eq.f32.partialorder %v1893_v18, %v886_v42  ;;  %v2006_v6 = vsub.f32 %v1075_v58, %v1977_v60 }
  0xc5   : > { %680 = vmatpush.msra.mxu3 %v1843_v47  ;;  %1363 = vmatmul.msk.f32.vlgmr.msrb.gmra.mxu0 %vm286_vm5, %v1904_v3  ;;  %v939_v47 = vand.u32 4294901760, %v1966_v34  ;;  %vm889_vm3 = vmor %vm883_vm0, %vm888_vm1  ;;  %v946_v12 = vsub.f32 %v1991_v1, %v945_v8 }
  0xc6   : > { %569 = vmatpush.msra.mxu0 %v1850_v50  ;;  %655 = vmatpush.msra.mxu2 %v538_v9  ;;  %v1998_v50 = vand.u32 4294901760, %v1074_v0  ;;  %v2034_v7 = vsel %vm889_vm3, 1.0, %v1652_v29 }
  0xc7   : > { %682 = vmatpush.msra.mxu3 %v1853_v53  ;;  %657 = vmatmul.f32.vlgmr.msra.gmra.mxu2 %v1895_v20  ;;  %v894_v17 = vsel %vm286_vm5, %v2034_v7, 0 }
  0xc8   : > { %572 = vmatpush.msra.mxu0 %v1856_v54  ;;  %759 = vmatpush.msrb.mxu1 %v758_v40  ;;  %v940_v54 = vsub.f32 %v1966_v34, %v939_v47  ;;  %v2022_v9 = vsub.f32 %v1074_v0, %v1998_v50  ;;  %v915_v25 = vsub.f32 %v894_v17, %v894_v17 }
  0xc9   : > { %684 = vmatpush.msra.mxu3 %v1864_v61  ;;  %839 = vmatpush.msrb.mxu2 %v756_v56  ;;  %v1069_v53 = vpop.permute.xlu1 %1068  ;;  %v733_v61 = vand.u32 4294901760, %v1994_v2 }
  0xca   : > { %686 = vmatmul.f32.vlgmr.msra.gmra.mxu3 %v1895_v20  ;;  %575 = vmatpush.msra.mxu0 %v1867_v62  ;;  %vm1071_vm4 = vcmp.eq.f32.partialorder %v1893_v18, %v1069_v53  ;;  %v1122_v62 = vand.u32 4294901760, %v2006_v6  ;;  %v941_v11 = vand.u32 4294901760, %v940_v54  ;;  %v1128_v15 = vand.u32 4294901760, %v2022_v9 }
  0xcb   : > { %765 = vmatpush.msrb.mxu1 %v764_v5  ;;  %843 = vmatpush.msrb.mxu2 %v762_v23  ;;  %vm1072_vm6 = vmor %vm1066_vm2, %vm1071_vm4  ;;  %v734_v14 = vsub.f32 %v1994_v2, %v733_v61  ;;  %v947_v18 = vand.u32 4294901760, %v946_v12  ;;  %v916_v31 = vand.u32 4294901760, %v915_v25 }
  0xcc   : > { %578 = vmatpush.msra.mxu0 %v1878_v4  ;;  %1365 = vmatmul.msk.f32.vlgmr.msrb.gmra.mxu1 %vm286_vm5, %v1958_v49  ;;  %v2031_v10 = vsel %vm1072_vm6, 1.0, %v1652_v29  ;;  %v1123_v16 = vsub.f32 %v2006_v6, %v1122_v62 }
  0xcd   : > { %581 = vmatmul.f32.vlgmr.msra.gmra.mxu0 %v1901_v24  ;;  %864 = vmatpush.msrb.mxu3 %v1912_v38  ;;  %v1077_v4 = vsel %vm286_vm5, %v2031_v10, 0  ;;  %v735_v20 = vand.u32 4294901760, %v734_v14  ;;  %v1129_v24 = vsub.f32 %v2022_v9, %v1128_v15  ;;  %v917_v36 = vsub.f32 %v915_v25, %v916_v31 }
  0xce   : > { %728 = vmatpush.msrb.mxu0 %v1912_v38  ;;  %812 = vmatpush.msra.mxu1 %v1912_v38  ;;  %v1098_v13 = vsub.f32 %v1077_v4, %v1077_v4  ;;  %v1124_v29 = vand.u32 4294901760, %v1123_v16 }
  0xcf   : > { %1366 = vmatmul.msk.f32.vlgmr.msrb.gmra.mxu2 %vm286_vm5, %v1958_v49  ;;  %866 = vmatpush.msrb.mxu3 %v1919_v46  ;;  %v1130_v30 = vand.u32 4294901760, %v1129_v24  ;;  %v918_v37 = vand.u32 4294901760, %v917_v36 }
  0xd0   : > { %730 = vmatpush.msrb.mxu0 %v1919_v46  ;;  %814 = vmatpush.msra.mxu1 %v1919_v46  ;;  %v1099_v21 = vand.u32 4294901760, %v1098_v13 }
  0xd1   : > { %970 = vmatpush.msra.mxu2 %v1966_v34  ;;  %995 = vmatpush.msra.mxu3 %v1948_v22 }
  0xd2   : > { %787 = vmatpush.msra.mxu0 %v1929_v26  ;;  %1367 = vmatmul.msk.f32.vlgmr.msrb.gmra.mxu3 %vm286_vm5, %v1958_v49  ;;  %v1100_v3 = vsub.f32 %v1098_v13, %v1099_v21 }
  0xd3   : > { %942 = vmatpush.msrb.mxu1 %v941_v11  ;;  %973 = vmatpush.msra.mxu2 %v1991_v1 }
  0xd4   : > { %818 = vmatmul.f32.vlgmr.msra.gmra.mxu1 %v733_v61  ;;  %790 = vmatpush.msra.mxu0 %v1939_v19  ;;  %v1101_v33 = vand.u32 4294901760, %v1100_v3  ;;  %v1473_v3 = vld [vmem:[%s2132_s3] ss:$0 sm:$0xff] }
  0xd5   : > { %736 = vmatmul.f32.vlgmr.msrb.gmra.mxu0 %v735_v20  ;;  %997 = vmatpush.msra.mxu3 %v1968_v57 }
  0xd6   : > { %948 = vmatpush.msrb.mxu1 %v947_v18  ;;  %1094 = vmatpush.msrb.mxu2 %v1977_v60 }
  0xd7   : > { %976 = vmatmul.f32.vlgmr.msra.gmra.mxu2 %v915_v25  ;;  %911 = vmatpush.msrb.mxu0 %v1948_v22 }
  0xd8   : > { %1096 = vmatpush.msrb.mxu2 %v1998_v50  ;;  %1125 = vmatpush.msrb.mxu3 %v1124_v29 }
  0xd9   : > { %913 = vmatpush.msrb.mxu0 %v1968_v57  ;;  %1047 = vmatpush.msra.mxu1 %v1948_v22 }
  0xda   : > { %1001 = vmatmul.f32.vlgmr.msra.gmra.mxu3 %v916_v31  ;;  %1205 = vmatpush.msra.mxu2 %v1122_v62 }
  0xdb   : > { %1131 = vmatpush.msrb.mxu3 %v1130_v30  ;;  %1049 = vmatpush.msra.mxu1 %v1968_v57 }
  0xdc   : > { %1368 = vmatmul.msk.f32.vlgmr.msrb.gmra.mxu1 %vm286_vm5, %v2034_v7  ;;  %1209 = vmatpush.msra.mxu2 %v1128_v15 }
  0xdd   : > { %793 = vmatmul.f32.vlgmr.msra.gmra.mxu0 %v1994_v2  ;;  %1230 = vmatpush.msra.mxu3 %v1977_v60 }
  0xde   : > { %1022 = vmatpush.msra.mxu0 %v939_v47  ;;  %1178 = vmatpush.msrb.mxu1 %v1977_v60 }
  0xdf   : > { %1102 = vmatmul.f32.vlgmr.msrb.gmra.mxu2 %v1101_v33  ;;  %1232 = vmatpush.msra.mxu3 %v1998_v50 }
  0xe0   : > { %1026 = vmatpush.msra.mxu0 %v945_v8  ;;  %1180 = vmatpush.msrb.mxu1 %v1998_v50 }
  0xe2   : > { %1371 = vmatmul.msk.f32.vlgmr.msrb.gmra.mxu3 %vm286_vm5, %v2031_v10 }
  0xe4   : > { %1370 = vmatmul.msk.f32.vlgmr.msra.gmra.mxu1 %vm286_vm5, %v2034_v7 }
  0xe5   : > { %919 = vmatmul.f32.vlgmr.msrb.gmra.mxu0 %v918_v37 }
  0xe6   : > { %1153 = vmatpush.msrb.mxu0 %v2006_v6 }
  0xe7   : > { %1372 = vmatmul.msk.f32.vlgmr.msra.gmra.mxu2 %vm286_vm5, %v2031_v10 }
  0xe8   : > { %1156 = vmatpush.msrb.mxu0 %v2022_v9 }
  0xea   : > { %1373 = vmatmul.msk.f32.vlgmr.msra.gmra.mxu3 %vm286_vm5, %v2031_v10 }
  0xec   : > { %1184 = vmatmul.f32.vlgmr.msrb.gmra.mxu1 %v1099_v21 }
  0xed   : > { %1369 = vmatmul.msk.f32.vlgmr.msra.gmra.mxu0 %vm286_vm5, %v2034_v7 }
  0xf5   : > { %1159 = vmatmul.f32.vlgmr.msrb.gmra.mxu0 %v1098_v13 }
 0x12f   : > { %v345_v38 = vpop.f32.mrf.mxu1 }
 0x137   : > { %v446_v39 = vpop.f32.mrf.mxu1 }
 0x138   : > { %v314_v43 = vpop.f32.mrf.mxu0  ;;  %v371_v44 = vpop.f32.mrf.mxu2 }
 0x139   : > { %v346_v32 = vadd.f32 %v345_v38, %v314_v43 }
 0x13a   : > { %v396_v45 = vpop.f32.mrf.mxu3 }
 0x13b   : > { %v372_v23 = vadd.f32 %v371_v44, %v346_v32 }
 0x13d   : > { %v397_v27 = vadd.f32 %v396_v45, %v372_v23 }
 0x141   : > { %v613_v46 = vpop.f32.mrf.mxu1  ;;  %v483_v26 = vpop.f32.mrf.mxu2 }
 0x142   : > { %v423_v48 = vpop.f32.mrf.mxu0 }
 0x143   : > { %v424_v28 = vadd.f32 %v423_v48, %v397_v27 }
 0x144   : > { %v544_v51 = vpop.f32.mrf.mxu3 }
 0x145   : > { %v447_v57 = vadd.f32 %v446_v39, %v424_v28 }
 0x147   : > { %v484_v63 = vadd.f32 %v483_v26, %v447_v57 }
 0x149   : > { %v768_v55 = vpop.f32.mrf.mxu1  ;;  %v545_v0 = vadd.f32 %v544_v51, %v484_v63 }
 0x14a   : > { %v582_v52 = vpop.f32.mrf.mxu0  ;;  %v658_v19 = vpop.f32.mrf.mxu2 }
 0x14b   : > { %v583_v2 = vadd.f32 %v582_v52, %v545_v0 }
 0x14d   : > { %v687_v56 = vpop.f32.mrf.mxu3  ;;  %v614_v8 = vadd.f32 %v613_v46, %v583_v2 }
 0x14f   : > { %v659_v10 = vadd.f32 %v658_v19, %v614_v8 }
 0x151   : > { %v819_v41 = vpop.f32.mrf.mxu1  ;;  %v688_v15 = vadd.f32 %v687_v56, %v659_v10 }
 0x152   : > { %v737_v22 = vpop.f32.mrf.mxu0  ;;  %v846_v49 = vpop.f32.mrf.mxu2 }
 0x153   : > { %v769_v42 = vadd.f32 %v768_v55, %v737_v22 }
 0x155   : > { %v869_v58 = vpop.f32.mrf.mxu3 }
 0x159   : > { %v951_v59 = vpop.f32.mrf.mxu1 }
 0x15a   : > { %v794_v34 = vpop.f32.mrf.mxu0  ;;  %v977_v35 = vpop.f32.mrf.mxu2 }
 0x15b   : > { %v795_v1 = vadd.f32 %v794_v34, %v769_v42 }
 0x15d   : > { %v1002_v60 = vpop.f32.mrf.mxu3  ;;  %v820_v6 = vadd.f32 %v819_v41, %v795_v1 }
 0x15f   : > { %v847_v9 = vadd.f32 %v846_v49, %v820_v6 }
 0x161   : > { %v1052_v5 = vpop.f32.mrf.mxu1  ;;  %v870_v12 = vadd.f32 %v869_v58, %v847_v9 }
 0x162   : > { %v920_v40 = vpop.f32.mrf.mxu0  ;;  %v1103_v54 = vpop.f32.mrf.mxu2 }
 0x163   : > { %v952_v47 = vadd.f32 %v951_v59, %v920_v40  ;;  %v872_v20 = vadd.f32 %v870_v12, %v688_v15 }
 0x165   : > { %v978_v53 = vadd.f32 %v977_v35, %v952_v47  ;;  %v1134_v61 = vpop.f32.mrf.mxu3 }
 0x166   : > { %v1135_v7 = vadd.f32 %v1134_v61, %v1103_v54 }
 0x167   : > { %v1003_v62 = vadd.f32 %v1002_v60, %v978_v53 }
 0x169   : > { %v1185_v14 = vpop.f32.mrf.mxu1 }
 0x16a   : > { %v1029_v50 = vpop.f32.mrf.mxu0  ;;  %v1212_v18 = vpop.f32.mrf.mxu2 }
 0x16b   : > { %v1030_v4 = vadd.f32 %v1029_v50, %v1003_v62 }
 0x16d   : > { %v1053_v16 = vadd.f32 %v1052_v5, %v1030_v4  ;;  %v1235_v24 = vpop.f32.mrf.mxu3 }
 0x16f   : > { %v1055_v25 = vadd.f32 %v1053_v16, %v872_v20 }
 0x172   : > { %v1160_v11 = vpop.f32.mrf.mxu0 }
 0x173   : > { %v1161_v13 = vadd.f32 %v1160_v11, %v1135_v7 }
 0x175   : > { %v1186_v17 = vadd.f32 %v1185_v14, %v1161_v13 }
 0x177   : > { %v1213_v21 = vadd.f32 %v1212_v18, %v1186_v17 }
 0x179   : > { %v1236_v29 = vadd.f32 %v1235_v24, %v1213_v21 }
 0x17b   : > { %v1238_v30 = vadd.f32 %v1236_v29, %v1055_v25 }
 0x17d   : > { %v1243_v31 = vadd.f32 %v1473_v3, %v1238_v30 }
 0x17f   : > { %1244 = vst [vmem:[%s247_s22] sm:$0xff] %v1243_v31 }
 0x180   : > { %1591 = shalt.err (!%p1588_p9)
}
 0x181   : > { %1388 = dma.vmem_to_hbm [thread:$0]  (%p1747_p4), %s1259_s7, 128, %s1261_s9, %s1246_s10  }
 0x182 PF: > { %s1272_s14 = sand.u32 1, %s1622_s15   ;;  %p2140_p10 = scmp.ge.s32.totalorder %s1634_s18, 2 }
 0x183   : > { %s1273_s23 = scalar_lea.sflag [#allocation4], %s1272_s14 }
 0x184   : > { %p1402_p13 = pnand %p2140_p10, %p1751_p6 }
 0x186   : > { %p1403_p11 = pneg %p1402_p13 }
 0x188   : > { %1617 = dma.done.wait (%p1403_p11), %s1273_s23, 128  }
 0x189   : > { %1619 = vsyncadd (%p1403_p11), %s1273_s23, 4294967168  ;;  %p18_p0 = scmp.ge.s32.totalorder %s1721_s8, 4   ;;  %s2141_s15 = smov %s1626_s16 }
 0x18a   : > { %s2142_s16 = smov %s1630_s17  ;;  %s2143_s17 = smov %s1732_s11 }
 0x18b   : > { %s2144_s18 = smov %s1721_s8  ;;  %20 = sbr.rel (!%p18_p0) target bundleno = 6 (0x6), region = 89 }
 0x190   :  { %1279 = vsyncpa [#allocation3], 1 }
 0x191   :  { %1281 = vsyncpa [#allocation3 + $0x1], 1 }
 0x192   :  { %1282 = vsyncpa [#allocation6], 1 }
 0x193   :  { %1283 = vsyncpa [#allocation4], 1 }
 0x194   :  { %1285 = vsyncpa [#allocation4 + $0x1], 1 }

</bundles_post_ra>
